<compile_context>
chip_gen: v7x
topology: tpu7x:2x2x1
jax: 0.10.0
libtpu: 0.0.40
codegen_flags: <defaults>
</compile_context>

<pallas_src>
import functools

import jax
import jax.numpy as jnp
from jax import lax
from jax.experimental import pallas as pl
from jax.experimental.pallas import tpu as pltpu

NEG_SLOPE = 0.01   # torch.leaky_relu default
LN_EPS = 1e-5      # nn.LayerNorm default
H1, H2, OUT = 400, 300, 1


def _round_up(n, m):
    return ((n + m - 1) // m) * m


def _leaky_relu(x):
    # single VPU max instead of compare+select
    return jnp.maximum(x, NEG_SLOPE * x)


def _layer_norm(h, gamma, beta, inv_n):
    # Padded lanes of h / gamma / beta are exactly zero, so full-width sums
    # equal sums over the real features; single pass: var = E[h^2] - mean^2.
    mean = jnp.sum(h, axis=-1, keepdims=True) * inv_n
    ex2 = jnp.sum(h * h, axis=-1, keepdims=True) * inv_n
    var = ex2 - mean * mean
    return (h - mean) * lax.rsqrt(var + LN_EPS) * gamma + beta


def _critic_kernel(*refs, layer_norm, compute_dtype, inv_h1, inv_h2):
    if layer_norm:
        (x_ref, u_ref, w1x_ref, w1u_ref, b1_ref, w2_ref, b2_ref, w3_ref,
         b3_ref, g1_ref, be1_ref, g2_ref, be2_ref, o_ref) = refs
    else:
        (x_ref, u_ref, w1x_ref, w1u_ref, b1_ref, w2_ref, b2_ref, w3_ref,
         b3_ref, o_ref) = refs

    x = x_ref[...].astype(compute_dtype)
    u = u_ref[...].astype(compute_dtype)

    # ---- layer 1: fused concat -> two MXU dots on pre-split w1 halves ----
    h1 = (jnp.dot(x, w1x_ref[...], preferred_element_type=jnp.float32)
          + jnp.dot(u, w1u_ref[...], preferred_element_type=jnp.float32)
          + b1_ref[...])
    if layer_norm:
        h1 = _layer_norm(h1, g1_ref[...], be1_ref[...], inv_h1)
    h1 = _leaky_relu(h1)

    # ---- layer 2 ----
    h2 = jnp.dot(h1.astype(compute_dtype), w2_ref[...],
                 preferred_element_type=jnp.float32) + b2_ref[...]
    if layer_norm:
        h2 = _layer_norm(h2, g2_ref[...], be2_ref[...], inv_h2)
    h2 = _leaky_relu(h2)

    # ---- layer 3 (300 -> 1): VPU multiply + row reduce, lane-dense store ----
    q = jnp.sum(h2 * w3_ref[...], axis=-1, keepdims=True)
    o_ref[...] = q + b3_ref[...]   # b3 replicated across lanes; col 0 is q+b3


def init_critic_params(key, state_dim, action_dim, layer_norm=False):
    """Deterministic init matching nn.Linear / nn.LayerNorm defaults.
    Weights stored (in, out) = W.T so forward does x @ W."""
    dims = [(state_dim + action_dim, H1), (H1, H2), (H2, OUT)]
    params = {}
    for i, (fan_in, fan_out) in enumerate(dims, start=1):
        key, kw, kb = jax.random.split(key, 3)
        bound = 1.0 / jnp.sqrt(float(fan_in))
        params[f"w{i}"] = jax.random.uniform(kw, (fan_in, fan_out),
                                             jnp.float32, -bound, bound)
        params[f"b{i}"] = jax.random.uniform(kb, (fan_out,), jnp.float32,
                                             -bound, bound)
    if layer_norm:
        params["g1"] = jnp.ones((H1,), jnp.float32)
        params["be1"] = jnp.zeros((H1,), jnp.float32)
        params["g2"] = jnp.ones((H2,), jnp.float32)
        params["be2"] = jnp.zeros((H2,), jnp.float32)
    return params


def prepare_critic_params(params, state_dim, layer_norm=False,
                          compute_dtype=jnp.float32):
    """One-time pad / split / cast of raw params for the kernel (hoisted out of
    the per-call path)."""
    H1p, H2p = _round_up(H1, 128), _round_up(H2, 128)
    OUTp = _round_up(OUT, 128)

    def pad_cols(w, c):
        return jnp.pad(w, ((0, 0), (0, c - w.shape[1])))

    def pad_row(v, c):
        return jnp.pad(v.astype(jnp.float32), (0, c - v.shape[0])).reshape(1, c)

    w1 = params["w1"].astype(jnp.float32)
    prep = {
        "w1x": pad_cols(w1[:state_dim], H1p).astype(compute_dtype),
        "w1u": pad_cols(w1[state_dim:], H1p).astype(compute_dtype),
        "b1": pad_row(params["b1"], H1p),
        "w2": jnp.pad(params["w2"].astype(jnp.float32),
                      ((0, H1p - H1), (0, H2p - H2))).astype(compute_dtype),
        "b2": pad_row(params["b2"], H2p),
        # layer 3 stays f32: it runs on the VPU and is tiny.
        "w3": pad_row(params["w3"][:, 0], H2p),
        "b3": jnp.broadcast_to(params["b3"].astype(jnp.float32).reshape(1, 1),
                               (1, OUTp)),
    }
    if layer_norm:
        prep["g1"] = pad_row(params["g1"], H1p)
        prep["be1"] = pad_row(params["be1"], H1p)
        prep["g2"] = pad_row(params["g2"], H2p)
        prep["be2"] = pad_row(params["be2"], H2p)
    return prep


def critic_forward(x, u, prep, layer_norm=False):
    """x: [B, state_dim], u: [B, action_dim] -> q: [B, 1]."""
    B = x.shape[0]
    state_dim = prep["w1x"].shape[0]
    action_dim = prep["w1u"].shape[0]
    assert x.shape[1] == state_dim and u.shape[1] == action_dim
    H1p = prep["w1x"].shape[1]
    H2p = prep["w2"].shape[1]
    OUTp = prep["b3"].shape[1]
    compute_dtype = prep["w1x"].dtype

    # Batch tiling: weights stay VMEM-resident; activation tiles stream.
    if B <= 256:
        Bp = _round_up(B, 8)
        TB = Bp
    else:
        TB = 256
        Bp = _round_up(B, TB)

    x = x.astype(jnp.float32)
    u = u.astype(jnp.float32)
    if Bp != B:
        x = jnp.pad(x, ((0, Bp - B), (0, 0)))
        u = jnp.pad(u, ((0, Bp - B), (0, 0)))

    operands = [x, u, prep["w1x"], prep["w1u"], prep["b1"], prep["w2"],
                prep["b2"], prep["w3"], prep["b3"]]
    in_specs = [
        pl.BlockSpec((TB, state_dim), lambda i: (i, 0)),     # x tile
        pl.BlockSpec((TB, action_dim), lambda i: (i, 0)),    # u tile
        pl.BlockSpec((state_dim, H1p), lambda i: (0, 0)),    # weights: resident
        pl.BlockSpec((action_dim, H1p), lambda i: (0, 0)),
        pl.BlockSpec((1, H1p), lambda i: (0, 0)),
        pl.BlockSpec((H1p, H2p), lambda i: (0, 0)),
        pl.BlockSpec((1, H2p), lambda i: (0, 0)),
        pl.BlockSpec((1, H2p), lambda i: (0, 0)),
        pl.BlockSpec((1, OUTp), lambda i: (0, 0)),
    ]
    if layer_norm:
        operands += [prep["g1"], prep["be1"], prep["g2"], prep["be2"]]
        in_specs += [
            pl.BlockSpec((1, H1p), lambda i: (0, 0)),
            pl.BlockSpec((1, H1p), lambda i: (0, 0)),
            pl.BlockSpec((1, H2p), lambda i: (0, 0)),
            pl.BlockSpec((1, H2p), lambda i: (0, 0)),
        ]

    kernel = functools.partial(
        _critic_kernel, layer_norm=layer_norm, compute_dtype=compute_dtype,
        inv_h1=1.0 / H1, inv_h2=1.0 / H2)

    flops = 2 * Bp * ((state_dim + action_dim) * H1 + H1 * H2 + H2 * OUT)
    bytes_accessed = sum(int(op.size) * op.dtype.itemsize for op in operands)
    bytes_accessed += Bp * OUTp * 4

    out = pl.pallas_call(
        kernel,
        out_shape=jax.ShapeDtypeStruct((Bp, OUTp), jnp.float32),
        grid=(Bp // TB,),
        in_specs=in_specs,
        out_specs=pl.BlockSpec((TB, OUTp), lambda i: (i, 0)),
        compiler_params=pltpu.CompilerParams(
            dimension_semantics=("parallel",),
            vmem_limit_bytes=32 * 1024 * 1024),
        cost_estimate=pl.CostEstimate(
            flops=int(flops),
            transcendentals=int(2 * Bp if layer_norm else 0),
            bytes_accessed=int(bytes_accessed)),
    )(*operands)

    return out[:B, :OUT]


def _critic_forward_ref(x, u, params, layer_norm=False):
    """Pure-JAX reference for correctness checking."""
    h = jnp.concatenate([x, u], axis=1)
    h = h @ params["w1"] + params["b1"]
    if layer_norm:
        m = h.mean(-1, keepdims=True)
        v = h.var(-1, keepdims=True)
        h = (h - m) / jnp.sqrt(v + LN_EPS) * params["g1"] + params["be1"]
    h = jnp.maximum(h, NEG_SLOPE * h)
    h = h @ params["w2"] + params["b2"]
    if layer_norm:
        m = h.mean(-1, keepdims=True)
        v = h.var(-1, keepdims=True)
        h = (h - m) / jnp.sqrt(v + LN_EPS) * params["g2"] + params["be2"]
    h = jnp.maximum(h, NEG_SLOPE * h)
    return h @ params["w3"] + params["b3"]


if __name__ == "__main__":
    key = jax.random.PRNGKey(0)
    state_dim, action_dim = 16, 4
    kdata, kp, kp_ln = jax.random.split(key, 3)

    ok = True
    # (batch, layer_norm, compute_dtype, tolerance)
    cases = [
        (2, False, jnp.float32, 1e-4),     # default path, small batch
        (2, True, jnp.float32, 2e-4),      # LayerNorm path
        (300, False, jnp.float32, 1e-4),   # exercises batch grid + padding
        (2, False, jnp.bfloat16, 5e-2),    # bf16 MXU path (v6e/v7x)
    ]
    for batch, layer_norm, cdt, tol in cases:
        kx, ku = jax.random.split(jax.random.fold_in(kdata, batch))
        xb = jax.random.normal(kx, (batch, state_dim), jnp.float32)
        ub = jax.random.normal(ku, (batch, action_dim), jnp.float32)

        params = init_critic_params(kp_ln if layer_norm else kp,
                                    state_dim, action_dim, layer_norm)
        prep = prepare_critic_params(params, state_dim, layer_norm=layer_norm,
                                     compute_dtype=cdt)

        q = critic_forward(xb, ub, prep, layer_norm=layer_norm)
        jax.block_until_ready(q)
        q_ref = _critic_forward_ref(xb, ub, params, layer_norm=layer_norm)

        if q.shape != (batch, 1):
            ok = False
        if not jnp.allclose(q, q_ref, atol=tol, rtol=tol):
            ok = False

    if ok:
        print("KERNEL_OK")
</pallas_src>

<mosaic_0001>
module attributes {stable_mosaic.version = 11 : i64} {
  func.func @_critic_kernel(%arg0: i32, %arg1: memref<8x16xf32, #tpu.memory_space<vmem>>, %arg2: memref<8x4xf32, #tpu.memory_space<vmem>>, %arg3: memref<16x512xf32, #tpu.memory_space<vmem>>, %arg4: memref<4x512xf32, #tpu.memory_space<vmem>>, %arg5: memref<1x512xf32, #tpu.memory_space<vmem>>, %arg6: memref<512x384xf32, #tpu.memory_space<vmem>>, %arg7: memref<1x384xf32, #tpu.memory_space<vmem>>, %arg8: memref<1x384xf32, #tpu.memory_space<vmem>>, %arg9: memref<1x128xf32, #tpu.memory_space<vmem>>, %arg10: memref<8x128xf32, #tpu.memory_space<vmem>>) attributes {dimension_semantics = [#tpu.dimension_semantics<parallel>], iteration_bounds = array<i64: 1>, scalar_prefetch = 0 : i64, scratch_operands = 0 : i64, tpu.core_type = #tpu.core_type<tc>, window_params = [{transform_indices = @transform_0, window_bounds = array<i64: 8, 16>}, {transform_indices = @transform_1, window_bounds = array<i64: 8, 4>}, {pipeline_mode = #tpu.pipeline_mode<synchronous>, transform_indices = @transform_2, window_bounds = array<i64: 16, 512>}, {pipeline_mode = #tpu.pipeline_mode<synchronous>, transform_indices = @transform_3, window_bounds = array<i64: 4, 512>}, {pipeline_mode = #tpu.pipeline_mode<synchronous>, transform_indices = @transform_4, window_bounds = array<i64: 1, 512>}, {pipeline_mode = #tpu.pipeline_mode<synchronous>, transform_indices = @transform_5, window_bounds = array<i64: 512, 384>}, {pipeline_mode = #tpu.pipeline_mode<synchronous>, transform_indices = @transform_6, window_bounds = array<i64: 1, 384>}, {pipeline_mode = #tpu.pipeline_mode<synchronous>, transform_indices = @transform_7, window_bounds = array<i64: 1, 384>}, {pipeline_mode = #tpu.pipeline_mode<synchronous>, transform_indices = @transform_8, window_bounds = array<i64: 1, 128>}, {transform_indices = @transform_9, window_bounds = array<i64: 8, 128>}]} {
    %c0 = arith.constant 0 : index
    %c0_0 = arith.constant 0 : index
    %0 = vector.load %arg1[%c0, %c0_0] : memref<8x16xf32, #tpu.memory_space<vmem>>, vector<8x16xf32>
    %c0_1 = arith.constant 0 : index
    %c0_2 = arith.constant 0 : index
    %1 = vector.load %arg2[%c0_1, %c0_2] : memref<8x4xf32, #tpu.memory_space<vmem>>, vector<8x4xf32>
    %c0_3 = arith.constant 0 : index
    %c0_4 = arith.constant 0 : index
    %2 = vector.load %arg3[%c0_3, %c0_4] : memref<16x512xf32, #tpu.memory_space<vmem>>, vector<16x512xf32>
    %cst = arith.constant dense<0.000000e+00> : vector<8x512xf32>
    %3 = tpu.matmul %0, %2, %cst {dimension_numbers = #tpu.dot_dimension_numbers<[1], [0], [0], [1], [0, 0, 1, 1], [], []>} : vector<8x16xf32>, vector<16x512xf32>, vector<8x512xf32> -> vector<8x512xf32>
    %c0_5 = arith.constant 0 : index
    %c0_6 = arith.constant 0 : index
    %4 = vector.load %arg4[%c0_5, %c0_6] : memref<4x512xf32, #tpu.memory_space<vmem>>, vector<4x512xf32>
    %cst_7 = arith.constant dense<0.000000e+00> : vector<8x512xf32>
    %5 = tpu.matmul %1, %4, %cst_7 {dimension_numbers = #tpu.dot_dimension_numbers<[1], [0], [0], [1], [0, 0, 1, 1], [], []>} : vector<8x4xf32>, vector<4x512xf32>, vector<8x512xf32> -> vector<8x512xf32>
    %6 = arith.addf %3, %5 : vector<8x512xf32>
    %c0_8 = arith.constant 0 : index
    %c0_9 = arith.constant 0 : index
    %7 = vector.load %arg5[%c0_8, %c0_9] : memref<1x512xf32, #tpu.memory_space<vmem>>, vector<1x512xf32>
    %8 = vector.broadcast %7 : vector<1x512xf32> to vector<8x512xf32>
    %9 = arith.addf %6, %8 : vector<8x512xf32>
    %cst_10 = arith.constant 0.00999999977 : f32
    %10 = vector.broadcast %cst_10 : f32 to vector<8x512xf32>
    %11 = arith.mulf %10, %9 : vector<8x512xf32>
    %12 = arith.maximumf %9, %11 : vector<8x512xf32>
    %c0_11 = arith.constant 0 : index
    %c0_12 = arith.constant 0 : index
    %13 = vector.load %arg6[%c0_11, %c0_12] : memref<512x384xf32, #tpu.memory_space<vmem>>, vector<512x384xf32>
    %cst_13 = arith.constant dense<0.000000e+00> : vector<8x384xf32>
    %14 = tpu.matmul %12, %13, %cst_13 {dimension_numbers = #tpu.dot_dimension_numbers<[1], [0], [0], [1], [0, 0, 1, 1], [], []>} : vector<8x512xf32>, vector<512x384xf32>, vector<8x384xf32> -> vector<8x384xf32>
    %c0_14 = arith.constant 0 : index
    %c0_15 = arith.constant 0 : index
    %15 = vector.load %arg7[%c0_14, %c0_15] : memref<1x384xf32, #tpu.memory_space<vmem>>, vector<1x384xf32>
    %16 = vector.broadcast %15 : vector<1x384xf32> to vector<8x384xf32>
    %17 = arith.addf %14, %16 : vector<8x384xf32>
    %cst_16 = arith.constant 0.00999999977 : f32
    %18 = vector.broadcast %cst_16 : f32 to vector<8x384xf32>
    %19 = arith.mulf %18, %17 : vector<8x384xf32>
    %20 = arith.maximumf %17, %19 : vector<8x384xf32>
    %c0_17 = arith.constant 0 : index
    %c0_18 = arith.constant 0 : index
    %21 = vector.load %arg8[%c0_17, %c0_18] : memref<1x384xf32, #tpu.memory_space<vmem>>, vector<1x384xf32>
    %22 = vector.broadcast %21 : vector<1x384xf32> to vector<8x384xf32>
    %23 = arith.mulf %20, %22 : vector<8x384xf32>
    %cst_19 = arith.constant dense<0.000000e+00> : vector<8xf32>
    %24 = vector.multi_reduction <add>, %23, %cst_19 [1] : vector<8x384xf32> to vector<8xf32>
    %25 = vector.shape_cast %24 : vector<8xf32> to vector<8x1xf32>
    %c0_20 = arith.constant 0 : index
    %c0_21 = arith.constant 0 : index
    %26 = vector.load %arg9[%c0_20, %c0_21] : memref<1x128xf32, #tpu.memory_space<vmem>>, vector<1x128xf32>
    %27 = vector.broadcast %25 : vector<8x1xf32> to vector<8x128xf32>
    %28 = vector.broadcast %26 : vector<1x128xf32> to vector<8x128xf32>
    %29 = arith.addf %27, %28 : vector<8x128xf32>
    %c0_22 = arith.constant 0 : index
    %c0_23 = arith.constant 0 : index
    %30 = vector.load %arg10[%c0_22, %c0_23] : memref<8x128xf32, #tpu.memory_space<vmem>>, vector<8x128xf32>
    tpu.vector_store %arg10[%c0_22, %c0_23], %29 {strides = array<i32>} : memref<8x128xf32, #tpu.memory_space<vmem>>, vector<8x128xf32>,
    return
  }
  func.func @transform_0(%arg0: i32) -> (i32, i32) {
    %c0_i32 = arith.constant 0 : i32
    %c0_i32_0 = arith.constant 0 : i32
    return %arg0, %c0_i32 : i32, i32
  }
  func.func @transform_1(%arg0: i32) -> (i32, i32) {
    %c0_i32 = arith.constant 0 : i32
    %c0_i32_0 = arith.constant 0 : i32
    return %arg0, %c0_i32 : i32, i32
  }
  func.func @transform_2(%arg0: i32) -> (i32, i32) {
    %c0_i32 = arith.constant 0 : i32
    %c0_i32_0 = arith.constant 0 : i32
    %c0_i32_1 = arith.constant 0 : i32
    return %c0_i32, %c0_i32_0 : i32, i32
  }
  func.func @transform_3(%arg0: i32) -> (i32, i32) {
    %c0_i32 = arith.constant 0 : i32
    %c0_i32_0 = arith.constant 0 : i32
    %c0_i32_1 = arith.constant 0 : i32
    return %c0_i32, %c0_i32_0 : i32, i32
  }
  func.func @transform_4(%arg0: i32) -> (i32, i32) {
    %c0_i32 = arith.constant 0 : i32
    %c0_i32_0 = arith.constant 0 : i32
    %c0_i32_1 = arith.constant 0 : i32
    return %c0_i32, %c0_i32_0 : i32, i32
  }
  func.func @transform_5(%arg0: i32) -> (i32, i32) {
    %c0_i32 = arith.constant 0 : i32
    %c0_i32_0 = arith.constant 0 : i32
    %c0_i32_1 = arith.constant 0 : i32
    return %c0_i32, %c0_i32_0 : i32, i32
  }
  func.func @transform_6(%arg0: i32) -> (i32, i32) {
    %c0_i32 = arith.constant 0 : i32
    %c0_i32_0 = arith.constant 0 : i32
    %c0_i32_1 = arith.constant 0 : i32
    return %c0_i32, %c0_i32_0 : i32, i32
  }
  func.func @transform_7(%arg0: i32) -> (i32, i32) {
    %c0_i32 = arith.constant 0 : i32
    %c0_i32_0 = arith.constant 0 : i32
    %c0_i32_1 = arith.constant 0 : i32
    return %c0_i32, %c0_i32_0 : i32, i32
  }
  func.func @transform_8(%arg0: i32) -> (i32, i32) {
    %c0_i32 = arith.constant 0 : i32
    %c0_i32_0 = arith.constant 0 : i32
    %c0_i32_1 = arith.constant 0 : i32
    return %c0_i32, %c0_i32_0 : i32, i32
  }
  func.func @transform_9(%arg0: i32) -> (i32, i32) {
    %c0_i32 = arith.constant 0 : i32
    %c0_i32_0 = arith.constant 0 : i32
    return %arg0, %c0_i32 : i32, i32
  }
}

</mosaic_0001>

<bundles_post_ra>
// kernel: tpu_custom_call.1
= control target key start
LH: loop header
LB: loop body
LE: loop exit
PB: predicated region body
PF: predicated region fallthrough
CT: control target
= control target key end

     0   :  { %14 = vsyncpa [#allocation3], 0  ;;  %s1531_s0 = inlined_call_operand.hbm [shape: f32[8,16], index: 0, kind: input, shape index: {}]   ;;  %s1532_s1 = inlined_call_operand.vmem [shape: f32[8,4], index: 1, kind: input, shape index: {}]   ;;  %s1533_s2 = inlined_call_operand.hbm [shape: f32[16,512], index: 2, kind: input, shape index: {}]   ;;  %s1534_s3 = inlined_call_operand.vmem [shape: f32[4,512], index: 3, kind: input, shape index: {}]   ;;  %s1535_s4 = inlined_call_operand.vmem [shape: f32[1,512], index: 4, kind: input, shape index: {}]   ;;  %s1536_s5 = inlined_call_operand.hbm [shape: f32[512,384], index: 5, kind: input, shape index: {}]   ;;  %s1537_s6 = inlined_call_operand.vmem [shape: f32[1,384], index: 6, kind: input, shape index: {}]   ;;  %s1538_s7 = inlined_call_operand.vmem [shape: f32[1,384], index: 7, kind: input, shape index: {}]   ;;  %s1539_s8 = inlined_call_operand.vmem [shape: f32[1,128], index: 8, kind: input, shape index: {}]   ;;  %s1540_s9 = inlined_call_operand.hbm [shape: f32[8,128], index: 9, kind: output, shape index: {}]  }
   0x1   :  { %15 = vsyncpa [#allocation6], 0 }
   0x2   :  { %16 = vsyncpa [#allocation4], 0  ;;  %s1361_s30 = smov [#allocation5]   ;;  %s1267_s13 = scalar_lea.hbm %s1533_s2, 1024 }
   0x3   :  { %s34_s10 = sshll.u32 %s1361_s30, 4  ;;  %p1268_p0 = scmp.ne.s32.totalorder %s1533_s2, %s1267_s13  ;;  %s35_s10 = int_to_ptr.vmem [resolvable:$true] %s34_s10 }
   0x4   :  { %p1271_p1 = scmp.lt.u32.totalorder %s1267_s13, %s1533_s2 }
   0x6   :  { %p1273_p2 = pnand %p1271_p1, %p1268_p0 }
   0x8   :  { %1276 = shalt.err (!%p1273_p2)
}
   0x9   :  { %s1277_s18 = scalar_lea.vmem %s35_s10, 1024  ;;  %p1282_p4 = scmp.lt.s32.totalorder %s35_s10, %s35_s10 }
   0xa   :  { %p1278_p3 = scmp.ne.s32.totalorder %s35_s10, %s1277_s18  ;;  %p1283_p5 = scmp.lt.s32.totalorder %s1277_s18, %s1277_s18 }
   0xc   :  { %p1284_p6 = por %p1283_p5, %p1282_p4 }
   0xe   :  { %p1285_p7 = pnand %p1284_p6, %p1278_p3 }
  0x10   :  { %1288 = shalt.err (!%p1285_p7)
}
  0x11   :  { %s1362_s19 = smov 512   ;;  %s1363_s20 = smov 32  }
  0x12   :  { %40 = dma.hbm_to_vmem [thread:$0]  %s1533_s2, 1024, %s35_s10, [#allocation6], %s1362_s19, %s1362_s19, %s1363_s20  }
  0x13   :  { %s1364_s23 = smov [#allocation2]   ;;  %s1365_s25 = smov [#allocation7]  }
  0x14   :  { %s23_s24 = sshll.u32 %s1364_s23, 4  ;;  %s50_s26 = sshll.u32 %s1365_s25, 4  ;;  %s24_s24 = int_to_ptr.vmem [resolvable:$true] %s23_s24  ;;  %s51_s26 = int_to_ptr.vmem [resolvable:$true] %s50_s26 }
  0x15   :  { %s1289_s29 = scalar_lea.hbm %s1531_s0, 128 }
  0x16   :  { %p1290_p8 = scmp.ne.s32.totalorder %s1531_s0, %s1289_s29  ;;  %p1293_p9 = scmp.lt.u32.totalorder %s1289_s29, %s1531_s0 }
  0x18   :  { %p1295_p10 = pnand %p1293_p9, %p1290_p8 }
  0x1a   :  { %1298 = shalt.err (!%p1295_p10)
}
  0x1b   :  { %s1299_s2 = scalar_lea.vmem %s24_s24, 128  ;;  %p1304_p12 = scmp.lt.s32.totalorder %s24_s24, %s24_s24 }
  0x1c   :  { %p1300_p11 = scmp.ne.s32.totalorder %s24_s24, %s1299_s2  ;;  %p1305_p13 = scmp.lt.s32.totalorder %s1299_s2, %s1299_s2 }
  0x1e   :  { %p1306_p0 = por %p1305_p13, %p1304_p12 }
  0x20   :  { %p1307_p1 = pnand %p1306_p0, %p1300_p11 }
  0x22   :  { %1310 = shalt.err (!%p1307_p1)
}
  0x23   :  { %26 = dma.hbm_to_vmem [thread:$0]  %s1531_s0, 128, %s24_s24, [#allocation3]  }
  0x24   :  { %s1311_s17 = scalar_lea.hbm %s1536_s5, 24576 }
  0x25   :  { %p1312_p2 = scmp.ne.s32.totalorder %s1536_s5, %s1311_s17  ;;  %p1315_p3 = scmp.lt.u32.totalorder %s1311_s17, %s1536_s5 }
  0x27   :  { %p1317_p4 = pnand %p1315_p3, %p1312_p2 }
  0x29   :  { %1320 = shalt.err (!%p1317_p4)
}
  0x2a   :  { %s1321_s22 = scalar_lea.vmem %s51_s26, 24576  ;;  %p1326_p6 = scmp.lt.s32.totalorder %s51_s26, %s51_s26 }
  0x2b   :  { %p1322_p5 = scmp.ne.s32.totalorder %s51_s26, %s1321_s22  ;;  %p1327_p7 = scmp.lt.s32.totalorder %s1321_s22, %s1321_s22 }
  0x2d   :  { %p1328_p8 = por %p1327_p7, %p1326_p6 }
  0x2f   :  { %p1329_p9 = pnand %p1328_p8, %p1322_p5 }
  0x31   :  { %1332 = shalt.err (!%p1329_p9)
}
  0x32   :  { %s1366_s0 = smov 384   ;;  %s1367_s23 = smov 24  }
  0x33   :  { %56 = dma.hbm_to_vmem [thread:$0]  %s1536_s5, 24576, %s51_s26, [#allocation6], %s1366_s0, %s1366_s0, %s1367_s23  }
  0x34   :  { %1355 = dma.done.wait [#allocation3], 128  }
  0x35   :  { %1356 = vsyncadd [#allocation3], 4294967168 }
  0x36   :  { %1357 = dma.done.wait [#allocation6], 25600  }
  0x37   :  { %1358 = vsyncadd [#allocation6], 4294941696  ;;  %v1368_v0 = vmov 0.0   ;;  %v82_v1 = vld [vmem:[%s1534_s3] sm:$0xff]  ;;  %vm92_vm0 = vcmask 1043456   ;;  %v83_v2 = vld [vmem:[%s1534_s3 + $0x8] sm:$0xff] }
  0x38   :  { %165 = vmatprep.mubr.f32.mxu1 %v1368_v0  ;;  %v86_v3 = vcombine.high %v82_v1, %v82_v1  ;;  %v87_v4 = vcombine.high %v83_v2, %v83_v2  ;;  %v75_v5 = vld [vmem:[#allocation5 + $0x8] sm:$0xff]  ;;  %v73_v7 = vld [vmem:[%s1532_s1] sm:$0xff]  ;;  %vm88_vm1 = vcmask 31744   ;;  %v74_v8 = vld [vmem:[#allocation5] sm:$0xff]  ;;  %vm243_vm2 = vcmask 130048  }
  0x39   :  { %v79_v6 = vld [vmem:[#allocation5 + $0x28] sm:$0xff]  ;;  %v78_v10 = vld [vmem:[#allocation5 + $0x20] sm:$0xff]  ;;  %v77_v11 = vld [vmem:[#allocation5 + $0x18] sm:$0xff] }
  0x3a   :  { %969 = vmatprep.subr.msk.mxu1 %vm92_vm0, %v86_v3  ;;  %v1048_v9 = vpack.c.bf16 %v79_v6, %v75_v5  ;;  %v81_v12 = vld [vmem:[#allocation5 + $0x38] sm:$0xff]  ;;  %v424_v13 = vld [vmem:[#allocation7 + $0x8] sm:$0xff]  ;;  %v427_v14 = vld [vmem:[#allocation7 + $0x20] sm:$0xff]  ;;  %v1050_v20 = vpack.c.bf16 %v78_v10, %v74_v8 }
  0x3b   :  { %970 = vmatpush1.msk.msra.mxu1 %vm92_vm0, %v82_v1  ;;  %v423_v15 = vld [vmem:[#allocation7] sm:$0xff]  ;;  %v1056_v16 = vpack.c.bf16 %v427_v14, %v424_v13  ;;  %v426_v17 = vld [vmem:[#allocation7 + $0x18] sm:$0xff]  ;;  %v433_v19 = vld [vmem:[#allocation7 + $0x50] sm:$0xff]  ;;  %v1052_v26 = vpack.c.bf16 %v81_v12, %v77_v11 }
  0x3c   :  { %971 = vmatmul.mubr.msk.f32.vlgmr.msra.gmra.mrb[0].mxu1 %vm88_vm1, %v73_v7  ;;  %972 = vmatprep.subr.msk.mxu1 %vm92_vm0, %v87_v4  ;;  %v430_v18 = vld [vmem:[#allocation7 + $0x38] sm:$0xff]  ;;  %v1058_v21 = vpack.c.bf16 %v426_v17, %v423_v15  ;;  %v429_v23 = vld [vmem:[#allocation7 + $0x30] sm:$0xff]  ;;  %v432_v24 = vld [vmem:[#allocation7 + $0x48] sm:$0xff] }
  0x3d   :  { %973 = vmatpush1.msk.msra.mxu1 %vm92_vm0, %v83_v2  ;;  %236 = vmatprep.mubr.f32.mxu1 %v1368_v0  ;;  %v1060_v22 = vpack.c.bf16 %v433_v19, %v430_v18  ;;  %v436_v25 = vld [vmem:[#allocation7 + $0x68] sm:$0xff]  ;;  %v76_v27 = vld [vmem:[#allocation5 + $0x10] sm:$0xff]  ;;  %v439_v29 = vld [vmem:[#allocation7 + $0x80] sm:$0xff]  ;;  %v1062_v30 = vpack.c.bf16 %v432_v24, %v429_v23 }
  0x3e   :  { %1049 = vmatprep.subr.bf16.mxu1 %v1048_v9  ;;  %v80_v28 = vld [vmem:[#allocation5 + $0x30] sm:$0xff]  ;;  %1057 = vmatprep.subr.bf16.mxu0 %v1056_v16  ;;  %v1064_v31 = vpack.c.bf16 %v439_v29, %v436_v25  ;;  %v435_v32 = vld [vmem:[#allocation7 + $0x60] sm:$0xff]  ;;  %v438_v33 = vld [vmem:[#allocation7 + $0x78] sm:$0xff] }
  0x3f   :  { %1059 = vmatpush1.bf16.msra.mxu0 %v1058_v21  ;;  %v72_v34 = vld [vmem:[#allocation2] sm:$0xff]  ;;  %v1054_v35 = vpack.c.bf16 %v80_v28, %v76_v27  ;;  %v445_v37 = vld [vmem:[#allocation7 + $0xb0] sm:$0xff]  ;;  %v1066_v38 = vpack.c.bf16 %v438_v33, %v435_v32  ;;  %v444_v41 = vld [vmem:[#allocation7 + $0xa8] sm:$0xff] }
  0x40   :  { %974 = vmatmul.mubr.msk.f32.vlgmr.msra.gmra.mrb[2].mxu1 %vm88_vm1, %v73_v7  ;;  %1061 = vmatprep.subr.bf16.mxu0 %v1060_v22  ;;  %v442_v36 = vld [vmem:[#allocation7 + $0x98] sm:$0xff]  ;;  %v441_v40 = vld [vmem:[#allocation7 + $0x90] sm:$0xff]  ;;  %v448_v42 = vld [vmem:[#allocation7 + $0xc8] sm:$0xff] }
  0x41   :  { %1051 = vmatpush1.bf16.msra.mxu1 %v1050_v20  ;;  %311 = vmatprep.mubr.f32.mxu1 %v1368_v0  ;;  %v1068_v39 = vpack.c.bf16 %v445_v37, %v442_v36  ;;  %v451_v43 = vld [vmem:[#allocation7 + $0xe0] sm:$0xff]  ;;  %v473_v44 = vld [vmem:[#allocation7 + $0x190] sm:$0xff]  ;;  %v476_v45 = vld [vmem:[#allocation7 + $0x1a8] sm:$0xff]  ;;  %v1070_v46 = vpack.c.bf16 %v444_v41, %v441_v40 }
  0x42   :  { %1053 = vmatprep.subr.bf16.mxu1 %v1052_v26  ;;  %v447_v47 = vld [vmem:[#allocation7 + $0xc0] sm:$0xff]  ;;  %v1184_v48 = vpack.c.bf16 %v476_v45, %v473_v44  ;;  %v425_v49 = vld [vmem:[#allocation7 + $0x10] sm:$0xff]  ;;  %v1072_v50 = vpack.c.bf16 %v451_v43, %v448_v42  ;;  %v450_v51 = vld [vmem:[#allocation7 + $0xd8] sm:$0xff] }
  0x43   :  { %1063 = vmatpush1.bf16.msra.mxu0 %v1062_v30  ;;  %v454_v52 = vld [vmem:[#allocation7 + $0xf8] sm:$0xff]  ;;  %v428_v53 = vld [vmem:[#allocation7 + $0x28] sm:$0xff]  ;;  %v457_v54 = vld [vmem:[#allocation7 + $0x110] sm:$0xff]  ;;  %v1074_v61 = vpack.c.bf16 %v450_v51, %v447_v47 }
  0x44   :  { %975 = vmatmul.mubr.msk.f32.vlgmr.msra.gmra.mrb[0].mxu1 %vm243_vm2, %v72_v34  ;;  %1065 = vmatprep.subr.bf16.mxu0 %v1064_v31  ;;  %v1186_v55 = vpack.c.bf16 %v428_v53, %v425_v49  ;;  %v479_v56 = vld [vmem:[#allocation7 + $0x1c0] sm:$0xff]  ;;  %v482_v57 = vld [vmem:[#allocation7 + $0x1d8] sm:$0xff]  ;;  %v453_v62 = vld [vmem:[#allocation7 + $0xf0] sm:$0xff]  ;;  %v1076_v1 = vpack.c.bf16 %v457_v54, %v454_v52 }
  0x45   :  { %1055 = vmatpush1.bf16.msra.mxu1 %v1054_v35  ;;  %382 = vmatprep.mubr.f32.mxu1 %v1368_v0  ;;  %v1188_v58 = vpack.c.bf16 %v482_v57, %v479_v56  ;;  %v431_v59 = vld [vmem:[#allocation7 + $0x40] sm:$0xff]  ;;  %v434_v60 = vld [vmem:[#allocation7 + $0x58] sm:$0xff]  ;;  %v485_v0 = vld [vmem:[#allocation7 + $0x1f0] sm:$0xff] }
  0x46   :  { %1185 = vmatprep.subr.bf16.mxu1 %v1184_v48  ;;  %v1190_v63 = vpack.c.bf16 %v434_v60, %v431_v59  ;;  %v456_v2 = vld [vmem:[#allocation7 + $0x108] sm:$0xff]  ;;  %v463_v5 = vld [vmem:[#allocation7 + $0x140] sm:$0xff]  ;;  %v437_v7 = vld [vmem:[#allocation7 + $0x70] sm:$0xff] }
  0x47   :  { %1067 = vmatpush1.bf16.msra.mxu0 %v1066_v38  ;;  %v460_v3 = vld [vmem:[#allocation7 + $0x128] sm:$0xff]  ;;  %v491_v9 = vld [vmem:[#allocation7 + $0x220] sm:$0xff]  ;;  %v494_v10 = vld [vmem:[#allocation7 + $0x238] sm:$0xff]  ;;  %v1078_v11 = vpack.c.bf16 %v456_v2, %v453_v62 }
  0x48   :  { %976 = vmatmul.mubr.msk.f32.vlgmr.msra.gmra.mrb[2].mxu1 %vm243_vm2, %v72_v34  ;;  %1069 = vmatprep.subr.bf16.mxu0 %v1068_v39  ;;  %v488_v4 = vld [vmem:[#allocation7 + $0x208] sm:$0xff]  ;;  %v459_v12 = vld [vmem:[#allocation7 + $0x120] sm:$0xff]  ;;  %v462_v13 = vld [vmem:[#allocation7 + $0x138] sm:$0xff]  ;;  %v1080_v15 = vpack.c.bf16 %v463_v5, %v460_v3  ;;  %v1196_v17 = vpack.c.bf16 %v494_v10, %v491_v9 }
  0x49   :  { %1187 = vmatpush3.bf16.msra.mxu1 %v1186_v55  ;;  %v1192_v6 = vpack.c.bf16 %v488_v4, %v485_v0  ;;  %v440_v8 = vld [vmem:[#allocation7 + $0x88] sm:$0xff]  ;;  %v466_v16 = vld [vmem:[#allocation7 + $0x158] sm:$0xff]  ;;  %v443_v18 = vld [vmem:[#allocation7 + $0xa0] sm:$0xff]  ;;  %v1082_v23 = vpack.c.bf16 %v462_v13, %v459_v12 }
  0x4a   :  { %1189 = vmatprep.subr.bf16.mxu1 %v1188_v58  ;;  %v1194_v14 = vpack.c.bf16 %v440_v8, %v437_v7  ;;  %v446_v19 = vld [vmem:[#allocation7 + $0xb8] sm:$0xff]  ;;  %v469_v20 = vld [vmem:[#allocation7 + $0x170] sm:$0xff]  ;;  %v500_v22 = vld [vmem:[#allocation7 + $0x268] sm:$0xff] }
  0x4b   :  { %1071 = vmatpush1.bf16.msra.mxu0 %v1070_v46  ;;  %v497_v21 = vld [vmem:[#allocation7 + $0x250] sm:$0xff]  ;;  %v468_v25 = vld [vmem:[#allocation7 + $0x168] sm:$0xff]  ;;  %v1198_v26 = vpack.c.bf16 %v446_v19, %v443_v18  ;;  %v1084_v27 = vpack.c.bf16 %v469_v20, %v466_v16  ;;  %v475_v32 = vld [vmem:[#allocation7 + $0x1a0] sm:$0xff] }
  0x4c   :  { %1073 = vmatprep.subr.bf16.mxu0 %v1072_v50  ;;  %v465_v24 = vld [vmem:[#allocation7 + $0x150] sm:$0xff]  ;;  %v472_v28 = vld [vmem:[#allocation7 + $0x188] sm:$0xff]  ;;  %v1200_v29 = vpack.c.bf16 %v500_v22, %v497_v21  ;;  %v503_v33 = vld [vmem:[#allocation7 + $0x280] sm:$0xff] }
  0x4d   :  { %1191 = vmatpush3.bf16.msra.mxu1 %v1190_v63  ;;  %v449_v30 = vld [vmem:[#allocation7 + $0xd0] sm:$0xff]  ;;  %v452_v31 = vld [vmem:[#allocation7 + $0xe8] sm:$0xff]  ;;  %v506_v34 = vld [vmem:[#allocation7 + $0x298] sm:$0xff]  ;;  %v1086_v35 = vpack.c.bf16 %v468_v25, %v465_v24  ;;  %v1088_v38 = vpack.c.bf16 %v475_v32, %v472_v28 }
  0x4e   :  { %1193 = vmatprep.subr.bf16.mxu1 %v1192_v6  ;;  %v471_v36 = vld [vmem:[#allocation7 + $0x180] sm:$0xff]  ;;  %v1202_v37 = vpack.c.bf16 %v452_v31, %v449_v30  ;;  %v474_v39 = vld [vmem:[#allocation7 + $0x198] sm:$0xff]  ;;  %v1204_v40 = vpack.c.bf16 %v506_v34, %v503_v33  ;;  %v481_v44 = vld [vmem:[#allocation7 + $0x1d0] sm:$0xff] }
  0x4f   :  { %1075 = vmatpush1.bf16.msra.mxu0 %v1074_v61  ;;  %v455_v41 = vld [vmem:[#allocation7 + $0x100] sm:$0xff]  ;;  %v458_v42 = vld [vmem:[#allocation7 + $0x118] sm:$0xff]  ;;  %v1090_v45 = vpack.c.bf16 %v474_v39, %v471_v36  ;;  %v477_v48 = vld [vmem:[#allocation7 + $0x1b0] sm:$0xff] }
  0x50   :  { %1077 = vmatprep.subr.bf16.mxu0 %v1076_v1  ;;  %v478_v43 = vld [vmem:[#allocation7 + $0x1b8] sm:$0xff]  ;;  %v1206_v46 = vpack.c.bf16 %v458_v42, %v455_v41  ;;  %v480_v49 = vld [vmem:[#allocation7 + $0x1c8] sm:$0xff]  ;;  %v487_v51 = vld [vmem:[#allocation7 + $0x200] sm:$0xff]  ;;  %v391_v41 = vlaneseq }
  0x51   :  { %1195 = vmatpush3.bf16.msra.mxu1 %v1194_v14  ;;  %v1092_v47 = vpack.c.bf16 %v481_v44, %v478_v43  ;;  %v484_v50 = vld [vmem:[#allocation7 + $0x1e8] sm:$0xff]  ;;  %v1094_v52 = vpack.c.bf16 %v480_v49, %v477_v48  ;;  %v483_v54 = vld [vmem:[#allocation7 + $0x1e0] sm:$0xff]  ;;  %v486_v55 = vld [vmem:[#allocation7 + $0x1f8] sm:$0xff] }
  0x52   :  { %1197 = vmatprep.subr.bf16.mxu1 %v1196_v17  ;;  %v1096_v53 = vpack.c.bf16 %v487_v51, %v484_v50  ;;  %v490_v56 = vld [vmem:[#allocation7 + $0x218] sm:$0xff]  ;;  %v493_v57 = vld [vmem:[#allocation7 + $0x230] sm:$0xff]  ;;  %v1098_v58 = vpack.c.bf16 %v486_v55, %v483_v54  ;;  %v492_v61 = vld [vmem:[#allocation7 + $0x228] sm:$0xff]  ;;  %v1477_v42 = vshrl.u32 %v391_v41, 7 }
  0x53   :  { %1079 = vmatpush1.bf16.msra.mxu0 %v1078_v11  ;;  %v1100_v59 = vpack.c.bf16 %v493_v57, %v490_v56  ;;  %v489_v60 = vld [vmem:[#allocation7 + $0x210] sm:$0xff]  ;;  %v496_v62 = vld [vmem:[#allocation7 + $0x248] sm:$0xff]  ;;  %v499_v63 = vld [vmem:[#allocation7 + $0x260] sm:$0xff] }
  0x54   :  { %1081 = vmatprep.subr.bf16.mxu0 %v1080_v15  ;;  %v1102_v0 = vpack.c.bf16 %v492_v61, %v489_v60  ;;  %v1104_v1 = vpack.c.bf16 %v499_v63, %v496_v62  ;;  %v495_v2 = vld [vmem:[#allocation7 + $0x240] sm:$0xff]  ;;  %v498_v3 = vld [vmem:[#allocation7 + $0x258] sm:$0xff]  ;;  %v505_v5 = vld [vmem:[#allocation7 + $0x290] sm:$0xff]  ;;  %v1480_v43 = vsub.s32 0, %v1477_v42  ;;  %v405_v48 = vsub.s32 3, %v1477_v42 }
  0x55   :  { %1199 = vmatpush3.bf16.msra.mxu1 %v1198_v26  ;;  %v502_v4 = vld [vmem:[#allocation7 + $0x278] sm:$0xff]  ;;  %v1106_v6 = vpack.c.bf16 %v498_v3, %v495_v2  ;;  %v501_v8 = vld [vmem:[#allocation7 + $0x270] sm:$0xff]  ;;  %v504_v9 = vld [vmem:[#allocation7 + $0x288] sm:$0xff] }
  0x56   :  { %1201 = vmatprep.subr.bf16.mxu1 %v1200_v29  ;;  %v1108_v7 = vpack.c.bf16 %v505_v5, %v502_v4  ;;  %v1110_v10 = vpack.c.bf16 %v504_v9, %v501_v8  ;;  %v508_v11 = vld [vmem:[#allocation7 + $0x2a8] sm:$0xff]  ;;  %v511_v12 = vld [vmem:[#allocation7 + $0x2c0] sm:$0xff]  ;;  %v509_v13 = vld [vmem:[#allocation7 + $0x2b0] sm:$0xff] }
  0x57   :  { %1083 = vmatpush1.bf16.msra.mxu0 %v1082_v23  ;;  %v1112_v14 = vpack.c.bf16 %v511_v12, %v508_v11  ;;  %v512_v15 = vld [vmem:[#allocation7 + $0x2c8] sm:$0xff]  ;;  %v507_v16 = vld [vmem:[#allocation7 + $0x2a0] sm:$0xff]  ;;  %v510_v18 = vld [vmem:[#allocation7 + $0x2b8] sm:$0xff] }
  0x58   :  { %1085 = vmatprep.subr.bf16.mxu0 %v1084_v27  ;;  %v1208_v17 = vpack.c.bf16 %v512_v15, %v509_v13  ;;  %v461_v19 = vld [vmem:[#allocation7 + $0x130] sm:$0xff]  ;;  %v464_v20 = vld [vmem:[#allocation7 + $0x148] sm:$0xff]  ;;  %v1114_v21 = vpack.c.bf16 %v510_v18, %v507_v16  ;;  %v514_v23 = vld [vmem:[#allocation7 + $0x2d8] sm:$0xff] }
  0x59   :  { %1203 = vmatpush3.bf16.msra.mxu1 %v1202_v37  ;;  %v1210_v22 = vpack.c.bf16 %v464_v20, %v461_v19  ;;  %v517_v24 = vld [vmem:[#allocation7 + $0x2f0] sm:$0xff]  ;;  %v515_v25 = vld [vmem:[#allocation7 + $0x2e0] sm:$0xff]  ;;  %v518_v27 = vld [vmem:[#allocation7 + $0x2f8] sm:$0xff] }
  0x5a   :  { %1205 = vmatprep.subr.bf16.mxu1 %v1204_v40  ;;  %v1116_v26 = vpack.c.bf16 %v517_v24, %v514_v23  ;;  %v513_v28 = vld [vmem:[#allocation7 + $0x2d0] sm:$0xff]  ;;  %v516_v29 = vld [vmem:[#allocation7 + $0x2e8] sm:$0xff]  ;;  %v1212_v30 = vpack.c.bf16 %v518_v27, %v515_v25  ;;  %v467_v32 = vld [vmem:[#allocation7 + $0x160] sm:$0xff] }
  0x5b   :  { %1087 = vmatpush1.bf16.msra.mxu0 %v1086_v35  ;;  %v1118_v31 = vpack.c.bf16 %v516_v29, %v513_v28  ;;  %v470_v33 = vld [vmem:[#allocation7 + $0x178] sm:$0xff]  ;;  %v520_v35 = vld [vmem:[#allocation7 + $0x308] sm:$0xff]  ;;  %v523_v36 = vld [vmem:[#allocation7 + $0x320] sm:$0xff] }
  0x5c   :  { %1089 = vmatprep.subr.bf16.mxu0 %v1088_v38  ;;  %v1214_v34 = vpack.c.bf16 %v470_v33, %v467_v32  ;;  %v569_v37 = vld [vmem:[#allocation7 + $0x490] sm:$0xff]  ;;  %v1120_v38 = vpack.c.bf16 %v523_v36, %v520_v35  ;;  %v572_v39 = vld [vmem:[#allocation7 + $0x4a8] sm:$0xff]  ;;  %v1485_v44 = vld [vmem:[%s1535_s4] sm:$0xf] }
  0x5d   :  { %1207 = vmatpush3.bf16.msra.mxu1 %v1206_v46  ;;  %v1216_v40 = vpack.c.bf16 %v572_v39, %v569_v37  ;;  %v394_v46 = vrot.slane %v1485_v44, %v1480_v43  ;;  %v519_v54 = vld [vmem:[#allocation7 + $0x300] sm:$0xff]  ;;  %v522_v55 = vld [vmem:[#allocation7 + $0x318] sm:$0xff]  ;;  %v521_v57 = vld [vmem:[#allocation7 + $0x310] sm:$0xff] }
  0x5e   :  { %1209 = vmatprep.subr.bf16.mxu1 %v1208_v17  ;;  %v529_v62 = vld [vmem:[#allocation7 + $0x350] sm:$0xff]  ;;  %v575_v63 = vld [vmem:[#allocation7 + $0x4c0] sm:$0xff]  ;;  %v1122_v4 = vpack.c.bf16 %v522_v55, %v519_v54  ;;  %v530_v12 = vld [vmem:[#allocation7 + $0x358] sm:$0xff] }
  0x5f   :  { %1091 = vmatpush1.bf16.msra.mxu0 %v1090_v45  ;;  %v1488_v45 = vsub.s32 1, %v1477_v42  ;;  %v527_v11 = vld [vmem:[#allocation7 + $0x340] sm:$0xff]  ;;  %v532_v13 = vld [vmem:[#allocation7 + $0x368] sm:$0xff]  ;;  %v581_v16 = vld [vmem:[#allocation7 + $0x4f0] sm:$0xff] }
  0x60   :  { %1093 = vmatprep.subr.bf16.mxu0 %v1092_v47  ;;  %v535_v15 = vld [vmem:[#allocation7 + $0x380] sm:$0xff]  ;;  %v584_v17 = vld [vmem:[#allocation7 + $0x508] sm:$0xff]  ;;  %v1222_v20 = vpack.c.bf16 %v530_v12, %v527_v11  ;;  %v533_v25 = vld [vmem:[#allocation7 + $0x370] sm:$0xff] }
  0x61   :  { %1211 = vmatpush3.bf16.msra.mxu1 %v1210_v22  ;;  %v398_v47 = vrot.slane %v1485_v44, %v1488_v45  ;;  %v534_v22 = vld [vmem:[#allocation7 + $0x378] sm:$0xff]  ;;  %v1128_v23 = vpack.c.bf16 %v535_v15, %v532_v13  ;;  %v1224_v24 = vpack.c.bf16 %v584_v17, %v581_v16  ;;  %v541_v28 = vld [vmem:[#allocation7 + $0x3b0] sm:$0xff]  ;;  %v587_v29 = vld [vmem:[#allocation7 + $0x520] sm:$0xff] }
  0x62   :  { %1213 = vmatprep.subr.bf16.mxu1 %v1212_v30  ;;  %v538_v27 = vld [vmem:[#allocation7 + $0x398] sm:$0xff]  ;;  %v537_v33 = vld [vmem:[#allocation7 + $0x390] sm:$0xff]  ;;  %v539_v37 = vld [vmem:[#allocation7 + $0x3a0] sm:$0xff] }
  0x63   :  { %1095 = vmatpush1.bf16.msra.mxu0 %v1094_v52  ;;  %v590_v30 = vld [vmem:[#allocation7 + $0x538] sm:$0xff]  ;;  %v1132_v35 = vpack.c.bf16 %v541_v28, %v538_v27  ;;  %v544_v39 = vld [vmem:[#allocation7 + $0x3c8] sm:$0xff]  ;;  %v593_v41 = vld [vmem:[#allocation7 + $0x550] sm:$0xff] }
  0x64   :  { %1097 = vmatprep.subr.bf16.mxu0 %v1096_v53  ;;  %v406_v53 = vrot.slane %v1485_v44, %v405_v48  ;;  %v1228_v36 = vpack.c.bf16 %v590_v30, %v587_v29  ;;  %v548_v54 = vld [vmem:[#allocation7 + $0x3e8] sm:$0xff]  ;;  %v550_v55 = vld [vmem:[#allocation7 + $0x3f8] sm:$0xff]  ;;  %v555_v11 = vld [vmem:[#allocation7 + $0x420] sm:$0xff] }
  0x65   :  { %1215 = vmatpush3.bf16.msra.mxu1 %v1214_v34  ;;  %v540_v34 = vld [vmem:[#allocation7 + $0x3a8] sm:$0xff]  ;;  %v558_v12 = vld [vmem:[#allocation7 + $0x438] sm:$0xff]  ;;  %v557_v15 = vld [vmem:[#allocation7 + $0x430] sm:$0xff] }
  0x66   :  { %1217 = vmatprep.subr.bf16.mxu1 %v1216_v40  ;;  %v547_v40 = vld [vmem:[#allocation7 + $0x3e0] sm:$0xff]  ;;  %v560_v16 = vld [vmem:[#allocation7 + $0x448] sm:$0xff]  ;;  %v562_v17 = vld [vmem:[#allocation7 + $0x458] sm:$0xff] }
  0x67   :  { %1099 = vmatpush1.bf16.msra.mxu0 %v1098_v58  ;;  %v524_v58 = vld [vmem:[#allocation7 + $0x328] sm:$0xff]  ;;  %v563_v27 = vld [vmem:[#allocation7 + $0x460] sm:$0xff]  ;;  %v566_v28 = vld [vmem:[#allocation7 + $0x478] sm:$0xff] }
  0x68   :  { %1101 = vmatprep.subr.bf16.mxu0 %v1100_v59  ;;  %v526_v59 = vld [vmem:[#allocation7 + $0x338] sm:$0xff]  ;;  %v1218_v5 = vpack.c.bf16 %v524_v58, %v521_v57  ;;  %v599_v57 = vld [vmem:[#allocation7 + $0x580] sm:$0xff]  ;;  %v568_v29 = vld [vmem:[#allocation7 + $0x488] sm:$0xff] }
  0x69   :  { %v1124_v9 = vpack.c.bf16 %v529_v62, %v526_v59  ;;  %v602_v58 = vld [vmem:[#allocation7 + $0x598] sm:$0xff]  ;;  %v549_v62 = vld [vmem:[#allocation7 + $0x3f0] sm:$0xff]  ;;  %v571_v30 = vld [vmem:[#allocation7 + $0x4a0] sm:$0xff] }
  0x6b   :  { %1103 = vmatpush1.bf16.msra.mxu0 %v1102_v0  ;;  %v578_v0 = vld [vmem:[#allocation7 + $0x4d8] sm:$0xff] }
  0x6c   :  { %1105 = vmatprep.subr.bf16.mxu0 %v1104_v1 }
  0x6f   :  { %1107 = vmatpush1.bf16.msra.mxu0 %v1106_v6  ;;  %v525_v6 = vld [vmem:[#allocation7 + $0x330] sm:$0xff] }
  0x70   :  { %1109 = vmatprep.subr.bf16.mxu0 %v1108_v7  ;;  %v528_v7 = vld [vmem:[#allocation7 + $0x348] sm:$0xff] }
  0x71   :  { %v1126_v19 = vpack.c.bf16 %v528_v7, %v525_v6  ;;  %v559_v6 = vld [vmem:[#allocation7 + $0x440] sm:$0xff]  ;;  %v605_v7 = vld [vmem:[#allocation7 + $0x5b0] sm:$0xff] }
  0x73   :  { %1111 = vmatpush1.bf16.msra.mxu0 %v1110_v10  ;;  %v1220_v10 = vpack.c.bf16 %v578_v0, %v575_v63  ;;  %v552_v63 = vld [vmem:[#allocation7 + $0x408] sm:$0xff]  ;;  %v1499_v0 = vsub.s32 2, %v1477_v42 }
  0x74   :  { %1113 = vmatprep.subr.bf16.mxu0 %v1112_v14 }
  0x75   :  { %v402_v42 = vrot.slane %v1485_v44, %v1499_v0 }
  0x77   :  { %1115 = vmatpush1.bf16.msra.mxu0 %v1114_v21  ;;  %v531_v21 = vld [vmem:[#allocation7 + $0x360] sm:$0xff] }
  0x78   :  { %1117 = vmatprep.subr.bf16.mxu0 %v1116_v26  ;;  %v536_v26 = vld [vmem:[#allocation7 + $0x388] sm:$0xff] }
  0x79   :  { %v1226_v32 = vpack.c.bf16 %v536_v26, %v533_v25  ;;  %v564_v26 = vld [vmem:[#allocation7 + $0x468] sm:$0xff] }
  0x7b   :  { %1119 = vmatpush1.bf16.msra.mxu0 %v1118_v31  ;;  %v1130_v31 = vpack.c.bf16 %v534_v22, %v531_v21  ;;  %v1146_v21 = vpack.c.bf16 %v558_v12, %v555_v11  ;;  %v1242_v22 = vpack.c.bf16 %v560_v16, %v557_v15  ;;  %v613_v15 = vld [vmem:[#allocation7 + $0x5f0] sm:$0xff] }
  0x7c   :  { %1121 = vmatprep.subr.bf16.mxu0 %v1120_v38  ;;  %v542_v38 = vld [vmem:[#allocation7 + $0x3b8] sm:$0xff] }
  0x7d   :  { %v1230_v48 = vpack.c.bf16 %v542_v38, %v539_v37  ;;  %v577_v37 = vld [vmem:[#allocation7 + $0x4d0] sm:$0xff] }
 0x117   :  { %v313_v49 = vpop.f32.mrb[0].mxu1 }
 0x118   :  { %v411_v50 = vadd.f32 %v394_v46, %v313_v49  ;;  %v315_v51 = vpop.f32.mrb[1].mxu1  ;;  %v596_v46 = vld [vmem:[#allocation7 + $0x568] sm:$0xff]  ;;  %v543_v49 = vld [vmem:[#allocation7 + $0x3c0] sm:$0xff] }
 0x119   :  { %v412_v52 = vadd.f32 %v398_v47, %v315_v51  ;;  %v1134_v47 = vpack.c.bf16 %v540_v34, %v537_v33  ;;  %v1136_v51 = vpack.c.bf16 %v547_v40, %v544_v39  ;;  %v1152_v34 = vpack.c.bf16 %v571_v30, %v568_v29 }
 0x11a   :  { %v415_v56 = vmul.f32 0.01, %v411_v50 }
 0x11b   :  { %v416_v60 = vmul.f32 0.01, %v412_v52  ;;  %v1496_v61 = vpop.f32.mrb[2].mxu1 }
 0x11c   :  { %v386_v1 = vpop.f32.mrb[3].mxu1  ;;  %v419_v8 = vmax.f32 %v411_v50, %v415_v56  ;;  %v546_v50 = vld [vmem:[#allocation7 + $0x3d8] sm:$0xff]  ;;  %v553_v56 = vld [vmem:[#allocation7 + $0x410] sm:$0xff] }
 0x11d   :  { %v414_v2 = vadd.f32 %v406_v53, %v386_v1  ;;  %v420_v3 = vmax.f32 %v412_v52, %v416_v60  ;;  %v1232_v52 = vpack.c.bf16 %v596_v46, %v593_v41  ;;  %v545_v53 = vld [vmem:[#allocation7 + $0x3d0] sm:$0xff]  ;;  %v1138_v59 = vpack.c.bf16 %v546_v50, %v543_v49  ;;  %v576_v46 = vld [vmem:[#allocation7 + $0x4c8] sm:$0xff] }
 0x11e   :  { %v1234_v60 = vpack.c.bf16 %v548_v54, %v545_v53  ;;  %v1140_v1 = vpack.c.bf16 %v553_v56, %v550_v55  ;;  %v573_v41 = vld [vmem:[#allocation7 + $0x4b0] sm:$0xff]  ;;  %v586_v53 = vld [vmem:[#allocation7 + $0x518] sm:$0xff] }
 0x11f   :  { %v418_v14 = vmul.f32 0.01, %v414_v2  ;;  %696 = vmatprep.mubr.f32.mxu0 %v420_v3  ;;  %838 = vmatprep.mubr.f32.mxu1 %v420_v3  ;;  %v551_v3 = vld [vmem:[#allocation7 + $0x400] sm:$0xff]  ;;  %v1158_v49 = vpack.c.bf16 %v576_v46, %v573_v41  ;;  %v589_v54 = vld [vmem:[#allocation7 + $0x530] sm:$0xff] }
 0x120   :  { %697 = vmatmul.mubr.f32.vlgmr.msra.gmra.mrb[0].mxu0 %v419_v8  ;;  %839 = vmatmul.mubr.f32.vlgmr.msra.gmra.mrb[4].mxu1 %v419_v8  ;;  %v608_v8 = vld [vmem:[#allocation7 + $0x5c8] sm:$0xff]  ;;  %v1164_v56 = vpack.c.bf16 %v589_v54, %v586_v53  ;;  %v977_v54 = vld [vmem:[%s1539_s8] ss:$0 sm:$0xff] }
 0x121   :  { %v422_v18 = vmax.f32 %v414_v2, %v418_v14  ;;  %1123 = vmatpush1.bf16.msra.mxu0 %v1122_v4  ;;  %1219 = vmatpush3.bf16.msra.mxu1 %v1218_v5  ;;  %v1236_v2 = vpack.c.bf16 %v602_v58, %v599_v57  ;;  %v554_v4 = vld [vmem:[#allocation7 + $0x418] sm:$0xff]  ;;  %v556_v5 = vld [vmem:[#allocation7 + $0x428] sm:$0xff]  ;;  %v1240_v14 = vpack.c.bf16 %v608_v8, %v605_v7  ;;  %v585_v57 = vld [vmem:[#allocation7 + $0x510] sm:$0xff] }
 0x122   :  { %1125 = vmatprep.subr.bf16.mxu0 %v1124_v9  ;;  %1221 = vmatprep.subr.bf16.mxu1 %v1220_v10  ;;  %v1142_v9 = vpack.c.bf16 %v552_v63, %v549_v62  ;;  %v1238_v10 = vpack.c.bf16 %v554_v4, %v551_v3  ;;  %v1144_v13 = vpack.c.bf16 %v559_v6, %v556_v5  ;;  %v588_v58 = vld [vmem:[#allocation7 + $0x528] sm:$0xff]  ;;  %v598_v3 = vld [vmem:[#allocation7 + $0x578] sm:$0xff]  ;;  %v601_v4 = vld [vmem:[#allocation7 + $0x590] sm:$0xff] }
 0x123   :  { %767 = vmatprep.mubr.f32.mxu0 %v422_v18  ;;  %908 = vmatprep.mubr.f32.mxu1 %v422_v18  ;;  %v565_v18 = vld [vmem:[#allocation7 + $0x470] sm:$0xff]  ;;  %v1166_v62 = vpack.c.bf16 %v588_v58, %v585_v57  ;;  %v1172_v6 = vpack.c.bf16 %v601_v4, %v598_v3  ;;  %v600_v8 = vld [vmem:[#allocation7 + $0x588] sm:$0xff] }
 0x124   :  { %v1148_v44 = vpack.c.bf16 %v565_v18, %v562_v17  ;;  %v597_v7 = vld [vmem:[#allocation7 + $0x570] sm:$0xff] }
 0x125   :  { %1127 = vmatpush1.bf16.msra.mxu0 %v1126_v19  ;;  %1223 = vmatpush3.bf16.msra.mxu1 %v1222_v20  ;;  %v611_v19 = vld [vmem:[#allocation7 + $0x5e0] sm:$0xff]  ;;  %v614_v20 = vld [vmem:[#allocation7 + $0x5f8] sm:$0xff]  ;;  %v1174_v11 = vpack.c.bf16 %v600_v8, %v597_v7  ;;  %v609_v18 = vld [vmem:[#allocation7 + $0x5d0] sm:$0xff] }
 0x126   :  { %1129 = vmatprep.subr.bf16.mxu0 %v1128_v23  ;;  %1225 = vmatprep.subr.bf16.mxu1 %v1224_v24  ;;  %v561_v23 = vld [vmem:[#allocation7 + $0x450] sm:$0xff]  ;;  %v413_v24 = vadd.f32 %v402_v42, %v1496_v61  ;;  %v1244_v25 = vpack.c.bf16 %v614_v20, %v611_v19  ;;  %v574_v61 = vld [vmem:[#allocation7 + $0x4b8] sm:$0xff]  ;;  %v603_v42 = vld [vmem:[#allocation7 + $0x5a0] sm:$0xff] }
 0x127   :  { %v1156_v40 = vpack.c.bf16 %v577_v37, %v574_v61  ;;  %v612_v19 = vld [vmem:[#allocation7 + $0x5e8] sm:$0xff]  ;;  %v920_v61 = vld [vmem:[%s1538_s7] sm:$0x7]  ;;  %s1369_s7 = smov [#allocation8]  }
 0x128   :  { %v417_v33 = vmul.f32 0.01, %v413_v24  ;;  %v1182_v20 = vpack.c.bf16 %v612_v19, %v609_v18  ;;  %s959_s10 = sshll.u32 %s1369_s7, 4  ;;  %s960_s10 = int_to_ptr.vmem [resolvable:$true] %s959_s10 }
 0x129   :  { %1131 = vmatpush1.bf16.msra.mxu0 %v1130_v31  ;;  %1227 = vmatpush3.bf16.msra.mxu1 %v1226_v32  ;;  %v1150_v31 = vpack.c.bf16 %v564_v26, %v561_v23  ;;  %v1246_v32 = vpack.c.bf16 %v566_v28, %v563_v27  ;;  %s1333_s14 = scalar_lea.vmem %s960_s10, 128  ;;  %p1338_p11 = scmp.lt.s32.totalorder %s960_s10, %s960_s10 }
 0x12a   :  { %1133 = vmatprep.subr.bf16.mxu0 %v1132_v35  ;;  %1229 = vmatprep.subr.bf16.mxu1 %v1228_v36  ;;  %v567_v35 = vld [vmem:[#allocation7 + $0x480] sm:$0xff]  ;;  %v570_v36 = vld [vmem:[#allocation7 + $0x498] sm:$0xff]  ;;  %v421_v39 = vmax.f32 %v413_v24, %v417_v33  ;;  %p1334_p10 = scmp.ne.s32.totalorder %s960_s10, %s1333_s14  ;;  %p1339_p12 = scmp.lt.s32.totalorder %s1333_s14, %s1333_s14 }
 0x12b   :  { %v1154_v38 = vpack.c.bf16 %v570_v36, %v567_v35  ;;  %v615_v24 = vld [vmem:[%s1537_s6] sm:$0x7] }
 0x12c   :  { %v620_v30 = vrot.slane %v615_v24, %v1480_v43  ;;  %p1340_p13 = por %p1339_p12, %p1338_p11 }
 0x12d   :  { %1135 = vmatpush1.bf16.msra.mxu0 %v1134_v47  ;;  %1231 = vmatpush3.bf16.msra.mxu1 %v1230_v48  ;;  %v580_v47 = vld [vmem:[#allocation7 + $0x4e8] sm:$0xff]  ;;  %v583_v48 = vld [vmem:[#allocation7 + $0x500] sm:$0xff] }
 0x12e   :  { %1137 = vmatprep.subr.bf16.mxu0 %v1136_v51  ;;  %1233 = vmatprep.subr.bf16.mxu1 %v1232_v52  ;;  %v1160_v50 = vpack.c.bf16 %v583_v48, %v580_v47  ;;  %v579_v51 = vld [vmem:[#allocation7 + $0x4e0] sm:$0xff]  ;;  %v582_v52 = vld [vmem:[#allocation7 + $0x4f8] sm:$0xff]  ;;  %v933_v48 = vrot.slane %v920_v61, %v1499_v0  ;;  %p1341_p0 = pnand %p1340_p13, %p1334_p10 }
 0x12f   :  { %v1162_v55 = vpack.c.bf16 %v582_v52, %v579_v51 }
 0x131   :  { %1139 = vmatpush1.bf16.msra.mxu0 %v1138_v59  ;;  %1235 = vmatpush3.bf16.msra.mxu1 %v1234_v60  ;;  %v592_v59 = vld [vmem:[#allocation7 + $0x548] sm:$0xff]  ;;  %v595_v60 = vld [vmem:[#allocation7 + $0x560] sm:$0xff] }
 0x132   :  { %1141 = vmatprep.subr.bf16.mxu0 %v1140_v1  ;;  %1237 = vmatprep.subr.bf16.mxu1 %v1236_v2  ;;  %v1168_v63 = vpack.c.bf16 %v595_v60, %v592_v59  ;;  %v591_v1 = vld [vmem:[#allocation7 + $0x540] sm:$0xff]  ;;  %v594_v2 = vld [vmem:[#allocation7 + $0x558] sm:$0xff] }
 0x133   :  { %v1170_v5 = vpack.c.bf16 %v594_v2, %v591_v1 }
 0x135   :  { %1143 = vmatpush1.bf16.msra.mxu0 %v1142_v9  ;;  %1239 = vmatpush3.bf16.msra.mxu1 %v1238_v10  ;;  %v604_v9 = vld [vmem:[#allocation7 + $0x5a8] sm:$0xff]  ;;  %v607_v10 = vld [vmem:[#allocation7 + $0x5c0] sm:$0xff] }
 0x136   :  { %1145 = vmatprep.subr.bf16.mxu0 %v1144_v13  ;;  %1241 = vmatprep.subr.bf16.mxu1 %v1240_v14  ;;  %v1176_v12 = vpack.c.bf16 %v607_v10, %v604_v9  ;;  %v606_v13 = vld [vmem:[#allocation7 + $0x5b8] sm:$0xff] }
 0x137   :  { %v610_v14 = vld [vmem:[#allocation7 + $0x5d8] sm:$0xff]  ;;  %v1178_v16 = vpack.c.bf16 %v606_v13, %v603_v42 }
 0x138   :  { %v1180_v17 = vpack.c.bf16 %v613_v15, %v610_v14 }
 0x139   :  { %1147 = vmatpush1.bf16.msra.mxu0 %v1146_v21  ;;  %1243 = vmatpush3.bf16.msra.mxu1 %v1242_v22 }
 0x13a   :  { %1149 = vmatprep.subr.bf16.mxu0 %v1148_v44  ;;  %1245 = vmatprep.subr.bf16.mxu1 %v1244_v25  ;;  %v628_v44 = vrot.slane %v615_v24, %v1499_v0 }
 0x13d   :  { %1151 = vmatpush1.bf16.msra.mxu0 %v1150_v31  ;;  %1247 = vmatpush3.bf16.msra.mxu1 %v1246_v32  ;;  %v624_v31 = vrot.slane %v615_v24, %v1488_v45 }
 0x13e   :  { %1153 = vmatprep.subr.bf16.mxu0 %v1152_v34 }
 0x140   :  { %909 = vmatmul.mubr.f32.vlgmr.msra.gmra.mrb[6].mxu1 %v421_v39 }
 0x141   :  { %1155 = vmatpush1.bf16.msra.mxu0 %v1154_v38  ;;  %v925_v38 = vrot.slane %v920_v61, %v1480_v43 }
 0x142   :  { %1157 = vmatprep.subr.bf16.mxu0 %v1156_v40  ;;  %v929_v40 = vrot.slane %v920_v61, %v1488_v45 }
 0x145   :  { %1159 = vmatpush1.bf16.msra.mxu0 %v1158_v49 }
 0x146   :  { %1161 = vmatprep.subr.bf16.mxu0 %v1160_v50 }
 0x149   :  { %1163 = vmatpush1.bf16.msra.mxu0 %v1162_v55 }
 0x14a   :  { %1165 = vmatprep.subr.bf16.mxu0 %v1164_v56 }
 0x14d   :  { %1167 = vmatpush1.bf16.msra.mxu0 %v1166_v62 }
 0x14e   :  { %1169 = vmatprep.subr.bf16.mxu0 %v1168_v63 }
 0x151   :  { %1171 = vmatpush1.bf16.msra.mxu0 %v1170_v5 }
 0x152   :  { %1173 = vmatprep.subr.bf16.mxu0 %v1172_v6 }
 0x155   :  { %1175 = vmatpush1.bf16.msra.mxu0 %v1174_v11 }
 0x156   :  { %1177 = vmatprep.subr.bf16.mxu0 %v1176_v12 }
 0x159   :  { %1179 = vmatpush1.bf16.msra.mxu0 %v1178_v16 }
 0x15a   :  { %1181 = vmatprep.subr.bf16.mxu0 %v1180_v17 }
 0x15d   :  { %1183 = vmatpush1.bf16.msra.mxu0 %v1182_v20 }
 0x160   :  { %768 = vmatmul.mubr.f32.vlgmr.msra.gmra.mrb[0].mxu0 %v421_v39 }
 0x1f3   :  { %v1010_v21 = vpop.f32.mrb[4].mxu1 }
 0x1f4   :  { %v1011_v22 = vpop.f32.mrb[5].mxu1 }
 0x1f5   :  { %v1012_v23 = vadd.f32 %v1011_v22, %v1010_v21 }
 0x1f7   :  { %v841_v27 = vadd.f32 %v1012_v23, %v628_v44 }
 0x213   :  { %v1045_v25 = vpop.f32.mrb[6].mxu1 }
 0x214   :  { %v1046_v26 = vpop.f32.mrb[7].mxu1 }
 0x215   :  { %v1047_v28 = vadd.f32 %v1046_v26, %v1045_v25 }
 0x217   :  { %v911_v29 = vadd.f32 %v1047_v28, %v841_v27 }
 0x219   :  { %v916_v35 = vmul.f32 0.01, %v911_v29 }
 0x21b   :  { %v919_v47 = vmax.f32 %v911_v29, %v916_v35 }
 0x21d   :  { %v939_v51 = vmul.f32 %v933_v48, %v919_v47 }
 0x233   :  { %v769_v32 = vpop.f32.mrb[0].mxu0 }
 0x234   :  { %v1248_v33 = vadd.f32 %v769_v32, %v620_v30  ;;  %v771_v34 = vpop.f32.mrb[1].mxu0 }
 0x235   :  { %v1249_v36 = vadd.f32 %v771_v34, %v624_v31 }
 0x236   :  { %v914_v37 = vmul.f32 0.01, %v1248_v33 }
 0x237   :  { %v915_v39 = vmul.f32 0.01, %v1249_v36 }
 0x238   :  { %v917_v41 = vmax.f32 %v1248_v33, %v914_v37 }
 0x239   :  { %v918_v46 = vmax.f32 %v1249_v36, %v915_v39 }
 0x23a   :  { %v937_v49 = vmul.f32 %v925_v38, %v917_v41 }
 0x23b   :  { %v938_v50 = vmul.f32 %v929_v40, %v918_v46 }
 0x23d   :  { %v940_v52 = vadd.f32 %v938_v50, %v937_v49 }
 0x23f   :  { %v941_v53 = vadd.f32 %v940_v52, %v939_v51 }
 0x241   :  { %942 = vadd.xlane.f32.xlu0 %v941_v53 }
 0x2ce   :  { %v943_v43 = vpop.xlane.xlu0 %942 }
 0x2cf   :  { %v951_v55 = vadd.f32 %v977_v54, %v943_v43 }
 0x2d1   :  { %952 = vst [vmem:[#allocation8] sm:$0xff] %v951_v55 }
 0x2d2   :  { %1344 = shalt.err (!%p1341_p0)
}
 0x2d3   :  { %s1345_s17 = scalar_lea.hbm %s1540_s9, 128 }
 0x2d4   :  { %p1346_p1 = scmp.ne.s32.totalorder %s1540_s9, %s1345_s17  ;;  %p1349_p2 = scmp.lt.u32.totalorder %s1345_s17, %s1540_s9 }
 0x2d6   :  { %p1351_p3 = pnand %p1349_p2, %p1346_p1 }
 0x2d8   :  { %1354 = shalt.err (!%p1351_p3)
}
 0x2d9   :  { %962 = dma.vmem_to_hbm [thread:$0]  %s960_s10, 128, %s1540_s9, [#allocation4]  }
 0x2da   :  { %1359 = dma.done.wait [#allocation4], 128  }
 0x2db   :  { %1360 = vsyncadd [#allocation4], 4294967168 }
 0x2dc   :  { %966 = vsyncpa [#allocation3], 1 }
 0x2dd   :  { %967 = vsyncpa [#allocation6], 1 }
 0x2de   :  { %968 = vsyncpa [#allocation4], 1 }

</bundles_post_ra>
